<compile_context>
chip_gen: v7x
topology: tpu7x:2x2x1
jax: 0.10.0
libtpu: 0.0.40
codegen_flags: <defaults>
</compile_context>

<pallas_src>
import functools

import jax
import jax.numpy as jnp
from jax.experimental import pallas as pl
from jax.experimental.pallas import tpu as pltpu

_LANE = 128
_MAX_LANE_WIDTH = 4096           # widest lane-dense last dim we try for
_BLOCK_BUDGET_BYTES = 2 << 20    # 2 MiB per block; 4 double-buffered copies
                                 # (2 in + 2 out) = 8 MiB -> safe within the
                                 # default scoped VMEM on v5e/v6e/v7x.


def _identity_kernel(x_ref, o_ref):
    # Pure whole-tile copy: one wide unmasked load + store per grid step.
    o_ref[...] = x_ref[...]


def _choose_layout(n_pad, itemsize):
    """Pick a lane-dense 2-D layout (rows, width) and a row-block size."""
    # Widest last dim that is a multiple of 128 and divides the flat length.
    width = _LANE
    for cand in range(_MAX_LANE_WIDTH, _LANE - 1, -_LANE):
        if n_pad % cand == 0:
            width = cand
            break
    rows = n_pad // width
    max_block_rows = max(1, _BLOCK_BUDGET_BYTES // (width * itemsize))
    if rows <= max_block_rows:
        block_rows = rows            # single full-extent block along rows
    else:
        # Largest power-of-two multiple of 8 that divides rows and fits the
        # VMEM budget (multiples of 8 also satisfy packed-dtype sublane reqs).
        block_rows = 8
        cand = 8
        while cand <= max_block_rows:
            if rows % cand == 0:
                block_rows = cand
            cand *= 2
    return rows, width, block_rows


@functools.partial(jax.jit, donate_argnums=(0,))
def pallas_identity(x):
    """Pass-through of `x` implemented as a Pallas TPU kernel.

    The input buffer is donated and the kernel output is aliased onto it, so
    no second HBM buffer is allocated for the copy.
    """
    orig_shape = x.shape
    n = x.size
    itemsize = jnp.dtype(x.dtype).itemsize

    # Only pad when the flat length is not already (8*128)-aligned; the
    # common NCHW case (C*H*W divisible by 1024) skips this entirely.
    tile = _LANE * 8
    n_pad = ((n + tile - 1) // tile) * tile
    x_flat = jnp.reshape(x, (-1,))
    if n_pad != n:
        x_flat = jnp.pad(x_flat, (0, n_pad - n))

    rows, width, block_rows = _choose_layout(n_pad, itemsize)
    x2d = jnp.reshape(x_flat, (rows, width))

    out2d = pl.pallas_call(
        _identity_kernel,
        out_shape=jax.ShapeDtypeStruct((rows, width), x2d.dtype),
        grid=(pl.cdiv(rows, block_rows),),
        in_specs=[pl.BlockSpec((block_rows, width), lambda i: (i, 0))],
        out_specs=pl.BlockSpec((block_rows, width), lambda i: (i, 0)),
        input_output_aliases={0: 0},
        compiler_params=pltpu.CompilerParams(
            dimension_semantics=("parallel",),
        ),
    )(x2d)

    out_flat = jnp.reshape(out2d, (-1,))
    if n_pad != n:
        out_flat = out_flat[:n]
    return jnp.reshape(out_flat, orig_shape)


def vgg_model_forward(x):
    """Exact semantics of VGGModel.forward: the body is `pass`, so it
    returns None regardless of input."""
    # TODO(synk): reference forward() has no ops (body is `pass`); nothing to lower.
    return None


if __name__ == "__main__":
    key = jax.random.PRNGKey(0)
    # NCHW, small shapes consistent with a VGG-style input.
    x = jax.random.normal(key, (2, 4, 16, 16), dtype=jnp.float32)
    # Independent copy for verification: `x` itself is donated to the kernel.
    x_expected = jnp.copy(x)

    y = pallas_identity(x)
    y = jax.block_until_ready(y)
    assert y.shape == x_expected.shape and y.dtype == x_expected.dtype
    assert bool(jnp.all(y == x_expected))

    # Exact module semantics: forward returns None.
    out = vgg_model_forward(x_expected)
    assert out is None

    print("KERNEL_OK")
</pallas_src>

<mosaic_0001>
module attributes {stable_mosaic.version = 11 : i64} {
  func.func @_identity_kernel(%arg0: i32, %arg1: memref<1x2048xf32, #tpu.memory_space<vmem>>, %arg2: memref<1x2048xf32, #tpu.memory_space<vmem>>) attributes {dimension_semantics = [#tpu.dimension_semantics<parallel>], iteration_bounds = array<i64: 1>, scalar_prefetch = 0 : i64, scratch_operands = 0 : i64, tpu.core_type = #tpu.core_type<tc>, window_params = [{transform_indices = @transform_0, window_bounds = array<i64: 1, 2048>}, {transform_indices = @transform_1, window_bounds = array<i64: 1, 2048>}]} {
    %c0 = arith.constant 0 : index
    %c0_0 = arith.constant 0 : index
    %0 = vector.load %arg1[%c0, %c0_0] : memref<1x2048xf32, #tpu.memory_space<vmem>>, vector<1x2048xf32>
    %c0_1 = arith.constant 0 : index
    %c0_2 = arith.constant 0 : index
    %1 = vector.load %arg2[%c0_1, %c0_2] : memref<1x2048xf32, #tpu.memory_space<vmem>>, vector<1x2048xf32>
    tpu.vector_store %arg2[%c0_1, %c0_2], %0 {strides = array<i32>} : memref<1x2048xf32, #tpu.memory_space<vmem>>, vector<1x2048xf32>,
    return
  }
  func.func @transform_0(%arg0: i32) -> (i32, i32) {
    %c0_i32 = arith.constant 0 : i32
    %c0_i32_0 = arith.constant 0 : i32
    return %arg0, %c0_i32 : i32, i32
  }
  func.func @transform_1(%arg0: i32) -> (i32, i32) {
    %c0_i32 = arith.constant 0 : i32
    %c0_i32_0 = arith.constant 0 : i32
    return %arg0, %c0_i32 : i32, i32
  }
}

</mosaic_0001>

<bundles_post_ra>
// kernel: pallas_identity.1
= control target key start
LH: loop header
LB: loop body
LE: loop exit
PB: predicated region body
PF: predicated region fallthrough
CT: control target
= control target key end

     0   :  { %s38_s0 = inlined_call_operand.vmem [shape: f32[1,2048], index: 0, kind: input, shape index: {}, may-alias: {0,1}]   ;;  %s39_s1 = inlined_call_operand.vmem [shape: f32[1,2048], index: 1, kind: output, shape index: {}, may-alias: {0,1}]  }
   0x1   :  { %v8_v0 = vld [vmem:[%s38_s0] sm:$0xff]  ;;  %v9_v1 = vld [vmem:[%s38_s0 + $0x8] sm:$0xff] }
   0x2   :  { %10 = vst [vmem:[%s39_s1] sm:$0xff] %v8_v0  ;;  %11 = vst [vmem:[%s39_s1 + $0x8] sm:$0xff] %v9_v1 }

</bundles_post_ra>
